<compile_context>
chip_gen: v7x
topology: tpu7x:2x2x1
jax: 0.10.0
libtpu: 0.0.40
codegen_flags: <defaults>
</compile_context>

<pallas_src>
import functools

import jax
import jax.numpy as jnp
import numpy as np
from jax.experimental import pallas as pl
from jax.experimental.pallas import tpu as pltpu


# ---------------------------------------------------------------------------
# Device / sizing helpers.
# ---------------------------------------------------------------------------

def _tpu_generation():
    """Best-effort TPU generation from device_kind ('TPU v5 lite' -> 5)."""
    try:
        kind = jax.devices()[0].device_kind.lower()
    except Exception:
        return 6
    for g in (7, 6, 5, 4, 3, 2):
        if (f"v{g}" in kind) or (f"tpu{g}" in kind):
            return g
    return 6


def _elementwise_dtype(gen):
    # v6e / v7x have bf16-capable VALU/EUP; v5e and older do not.
    return jnp.bfloat16 if gen >= 6 else jnp.float32


def _pick_l_tile(L, C, gen):
    """Largest multiple-of-8 divisor of L that fits the per-generation budget."""
    # 128-MiB-VMEM parts (v4/v5e/v6e) afford big tiles; v7x has 64 MiB per TC.
    max_tile = 2048 if gen in (4, 5, 6) else (1024 if gen >= 7 else 512)
    # Rough per-row VMEM bytes: double-buffered bf16 x tile + f32 out tile +
    # f32 elementwise intermediates (h, rolls, taps, acc).
    per_row = 2 * C * 2 + 2 * C * 4 + 8 * (2 * C) * 4
    budget = (72 << 20) if gen in (4, 5, 6) else ((32 << 20) if gen >= 7 else (8 << 20))
    max_tile = min(max_tile, max(8, (budget // per_row) // 8 * 8))
    best = 8
    t = 8
    while t <= min(L, max_tile):
        if L % t == 0:
            best = t
        t += 8
    return best


def _vmem_limit_bytes(l_tile, C, gen):
    """Vmem limit from the real per-tile footprint, with headroom + a cap."""
    C2 = 2 * C
    x_bytes = 2 * l_tile * C * 2          # bf16 x tile, double-buffered
    halo_bytes = 2 * 2 * 8 * C * 2        # two 8-row halo blocks, double-buffered
    out_bytes = 2 * l_tile * C * 4        # f32 out tile, double-buffered
    w_bytes = (C * C2 + C2 * C) * 2 + 6 * C2 * 4 + C * 4
    interm_bytes = 8 * l_tile * C2 * 4    # h / rolls / taps / acc (f32 bound)
    total = x_bytes + halo_bytes + out_bytes + w_bytes + interm_bytes
    total = int(total * 1.5) + (8 << 20)  # compiler-internal scratch headroom
    cap = (96 << 20) if gen in (4, 5, 6) else ((44 << 20) if gen >= 7 else (12 << 20))
    return int(min(cap, max(8 << 20, total)))


# ---------------------------------------------------------------------------
# Kernel.
# ---------------------------------------------------------------------------

def _gelu_sigmoid(x):
    # GELU(x) ~= x * sigmoid(1.702 x) = 0.5*x*(1 + tanh(0.851 x)).
    # One EUP tanh + ~4 VALU ops per element (vs ~8 for the cubic-tanh form).
    half_x = jnp.asarray(0.5, x.dtype) * x
    return half_x + half_x * jnp.tanh(jnp.asarray(0.851, x.dtype) * x)


def _iffn_kernel(x_ref, xl_ref, xr_ref, w1_ref, b1_ref, wc_ref, bc_ref,
                 w2_ref, b2_ref, o_ref, *, compute_dtype):
    lt = x_ref.shape[0]                    # L_tile
    li = pl.program_id(1)
    n_l = pl.num_programs(1)

    w1 = w1_ref[...]                       # (C, 2C) bf16
    b1 = b1_ref[...]                       # (1, 2C) f32

    # ---- linear1 (1x1 conv) on the MXU: bf16 operands, f32 accumulation.
    h = jnp.dot(x_ref[...], w1, preferred_element_type=jnp.float32) + b1
    h = _gelu_sigmoid(h)                   # (lt, 2C) f32

    # ---- Halo rows.  The k=3 depthwise conv needs h[tile_start-1] and
    # h[tile_end]: at interior tile edges these are real neighbour rows
    # (recomputed from the 8-row halo x blocks -- two tiny M=8 MXU matmuls);
    # at the true sequence boundaries they are the Conv1d zero padding of the
    # *post-GELU* activation, i.e. exactly 0.
    hl = jnp.dot(xl_ref[...], w1, preferred_element_type=jnp.float32) + b1
    hr = jnp.dot(xr_ref[...], w1, preferred_element_type=jnp.float32) + b1
    h_left = _gelu_sigmoid(hl[7:8, :])     # row tile_start - 1
    h_right = _gelu_sigmoid(hr[0:1, :])    # row tile_end
    zero_row = jnp.zeros_like(h_left)
    h_left = jnp.where(li == 0, zero_row, h_left)
    h_right = jnp.where(li == n_l - 1, zero_row, h_right)

    # ---- Depthwise k=3 conv along L.  Shifted taps come from XLU sublane
    # rolls of the aligned (lt, 2C) block (no unaligned concat/slice
    # relayouts); only row 0 / row lt-1 get patched with the halo rows.
    row = jax.lax.broadcasted_iota(jnp.int32, (lt, 1), 0)
    h_prev = jnp.where(row == 0, h_left, pltpu.roll(h, shift=1, axis=0))
    h_next = jnp.where(row == lt - 1, h_right,
                       pltpu.roll(h, shift=lt - 1, axis=0))

    wc = wc_ref[...]                       # (3, 2C) f32 taps (tap 0 = t-1)
    c = (h_prev * wc[0:1, :] + h * wc[1:2, :] + h_next * wc[2:3, :]
         + bc_ref[...])

    # Second GELU runs in the elementwise compute dtype (bf16 on v6e/v7x --
    # the bf16 cast is needed for the second MXU matmul anyway).
    c = _gelu_sigmoid(c.astype(compute_dtype))

    # ---- linear2 (1x1 conv) on the MXU.
    out = jnp.dot(c.astype(jnp.bfloat16), w2_ref[...],
                  preferred_element_type=jnp.float32) + b2_ref[...]
    o_ref[...] = out.astype(o_ref.dtype)


# ---------------------------------------------------------------------------
# Wrapper.
# ---------------------------------------------------------------------------

def iffn_forward(x, w1, b1, wc, bc, w2, b2, *, l_tile=None):
    """IFFN forward.  x: (B, L, C).  Weights stored transposed vs PyTorch:
    w1: (C, 2C), wc: (3, 2C) depthwise taps (tap 0 = position t-1, i.e.
    cross-correlation orientation), w2: (2C, C); biases b1/bc: (1, 2C),
    b2: (1, C).  Dropout p=0 => identity."""
    B, L, C = x.shape
    C2 = 2 * C
    assert w1.shape == (C, C2) and w2.shape == (C2, C)
    assert b1.shape == (1, C2) and wc.shape == (3, C2)
    assert bc.shape == (1, C2) and b2.shape == (1, C)
    assert L % 8 == 0, "sequence length must be a multiple of 8 (sublane tile)"

    gen = _tpu_generation()
    compute_dtype = _elementwise_dtype(gen)
    if l_tile is None:
        l_tile = _pick_l_tile(L, C, gen)
    assert l_tile % 8 == 0 and L % l_tile == 0

    n_l = L // l_tile            # L tiles per batch element
    lt8 = l_tile // 8            # 8-row blocks per L tile
    n_b8 = L // 8                # 8-row blocks along L

    # bf16 activations/weights for the MXU (f32 accumulation in-kernel):
    # halves the dominant x DMA and the weight footprint.  Biases and the
    # depthwise taps feed f32 VPU adds and stay f32.
    xb = x.astype(jnp.bfloat16)
    w1b = w1.astype(jnp.bfloat16)
    w2b = w2.astype(jnp.bfloat16)

    x_map = lambda b, l: (b, l, 0)
    # Left halo: 8-row block whose last row is x[tile_start - 1] (clamped at
    # the sequence start; that row is replaced by the zero pad in-kernel).
    xl_map = lambda b, l: (b, jnp.maximum(l * lt8 - 1, 0), 0)
    # Right halo: 8-row block whose first row is x[tile_end] (clamped at the
    # sequence end; replaced by the zero pad in-kernel).
    xr_map = lambda b, l: (b, jnp.minimum((l + 1) * lt8, n_b8 - 1), 0)
    const = lambda b, l: (0, 0)

    def wspec(shape):
        # Grid-invariant operands: single-buffered (halves their VMEM).
        return pl.BlockSpec(shape, const, pipeline_mode=pl.Buffered(1))

    kernel = functools.partial(_iffn_kernel, compute_dtype=compute_dtype)

    return pl.pallas_call(
        kernel,
        out_shape=jax.ShapeDtypeStruct((B, L, C), x.dtype),
        grid=(B, n_l),
        in_specs=[
            pl.BlockSpec((pl.Squeezed(), l_tile, C), x_map),   # x tile (bf16)
            pl.BlockSpec((pl.Squeezed(), 8, C), xl_map),       # left halo blk
            pl.BlockSpec((pl.Squeezed(), 8, C), xr_map),       # right halo blk
            wspec((C, C2)),      # W1^T (bf16)
            wspec((1, C2)),      # b1
            wspec((3, C2)),      # depthwise taps
            wspec((1, C2)),      # depthwise bias
            wspec((C2, C)),      # W2^T (bf16)
            wspec((1, C)),       # b2
        ],
        out_specs=pl.BlockSpec((pl.Squeezed(), l_tile, C), x_map),
        compiler_params=pltpu.CompilerParams(
            dimension_semantics=("parallel", "parallel"),
            vmem_limit_bytes=_vmem_limit_bytes(l_tile, C, gen),
        ),
    )(xb, xb, xb, w1b, b1, wc, bc, w2b, b2)


# ---------------------------------------------------------------------------
# References.
# ---------------------------------------------------------------------------

def iffn_ref(x, w1, b1, wc, bc, w2, b2):
    # Exact reference matching the PyTorch module (erf GELU, f32 matmuls).
    h = jax.nn.gelu(x @ w1 + b1, approximate=False)
    hp = jnp.pad(h, ((0, 0), (1, 1), (0, 0)))
    c = hp[:, :-2] * wc[0] + hp[:, 1:-1] * wc[1] + hp[:, 2:] * wc[2] + bc
    c = jax.nn.gelu(c, approximate=False)
    return c @ w2 + b2


def iffn_ref_lowp(x, w1, b1, wc, bc, w2, b2, *, compute_dtype):
    # Reference mimicking the kernel numerics exactly (bf16 MXU operands with
    # f32 accumulation, sigmoid-GELU, second GELU in `compute_dtype`).
    bf = jnp.bfloat16
    h = jnp.dot(x.astype(bf), w1.astype(bf),
                preferred_element_type=jnp.float32) + b1
    h = _gelu_sigmoid(h)
    hp = jnp.pad(h, ((0, 0), (1, 1), (0, 0)))
    c = hp[:, :-2] * wc[0] + hp[:, 1:-1] * wc[1] + hp[:, 2:] * wc[2] + bc
    c = _gelu_sigmoid(c.astype(compute_dtype))
    return jnp.dot(c.astype(bf), w2.astype(bf),
                   preferred_element_type=jnp.float32) + b2


if __name__ == "__main__":
    B, L, C = 2, 64, 32
    C2 = 2 * C

    key = jax.random.PRNGKey(0)
    kx, k1, kb1, kc, kbc, k2, kb2 = jax.random.split(key, 7)

    x = jax.random.normal(kx, (B, L, C), dtype=jnp.float32)

    # Synthetic parameters with the shapes implied by the PyTorch __init__:
    # linear1.weight (2C, C, 1) stored transposed as (C, 2C), etc.
    w1 = jax.random.normal(k1, (C, C2), dtype=jnp.float32) * (1.0 / np.sqrt(C))
    b1 = jax.random.normal(kb1, (1, C2), dtype=jnp.float32) * 0.1
    wc = jax.random.normal(kc, (3, C2), dtype=jnp.float32) * (1.0 / np.sqrt(3.0))
    bc = jax.random.normal(kbc, (1, C2), dtype=jnp.float32) * 0.1
    w2 = jax.random.normal(k2, (C2, C), dtype=jnp.float32) * (1.0 / np.sqrt(C2))
    b2 = jax.random.normal(kb2, (1, C), dtype=jnp.float32) * 0.1

    gen = _tpu_generation()
    cdt = _elementwise_dtype(gen)

    # l_tile=16 exercises the multi-tile halo path (4 L tiles per batch elem);
    # the default pick exercises the single-tile path.
    out_tiled = jax.block_until_ready(
        iffn_forward(x, w1, b1, wc, bc, w2, b2, l_tile=16))
    out_full = jax.block_until_ready(
        iffn_forward(x, w1, b1, wc, bc, w2, b2))

    ref_lp = jax.block_until_ready(
        iffn_ref_lowp(x, w1, b1, wc, bc, w2, b2, compute_dtype=cdt))
    ref = jax.block_until_ready(iffn_ref(x, w1, b1, wc, bc, w2, b2))

    # Tight check vs. a reference with matching numerics (validates tiling,
    # halo handling, depthwise taps, biases).
    tight = 4e-2 if cdt == jnp.bfloat16 else 5e-3
    np.testing.assert_allclose(np.asarray(out_tiled), np.asarray(ref_lp),
                               rtol=tight, atol=tight)
    np.testing.assert_allclose(np.asarray(out_full), np.asarray(ref_lp),
                               rtol=tight, atol=tight)
    # Looser sanity check vs. the exact (erf-GELU, f32-matmul) PyTorch math:
    # the gap is the deliberate bf16-MXU-operand + sigmoid-GELU choice.
    np.testing.assert_allclose(np.asarray(out_tiled), np.asarray(ref),
                               rtol=1e-1, atol=2e-1)
    print("KERNEL_OK")
</pallas_src>

<mosaic_0001>
module attributes {stable_mosaic.version = 11 : i64} {
  func.func @_iffn_kernel(%arg0: i32, %arg1: i32, %arg2: memref<1x16x32xbf16, #tpu.memory_space<vmem>>, %arg3: memref<1x8x32xbf16, #tpu.memory_space<vmem>>, %arg4: memref<1x8x32xbf16, #tpu.memory_space<vmem>>, %arg5: memref<32x64xbf16, #tpu.memory_space<vmem>>, %arg6: memref<1x64xf32, #tpu.memory_space<vmem>>, %arg7: memref<3x64xf32, #tpu.memory_space<vmem>>, %arg8: memref<1x64xf32, #tpu.memory_space<vmem>>, %arg9: memref<64x32xbf16, #tpu.memory_space<vmem>>, %arg10: memref<1x32xf32, #tpu.memory_space<vmem>>, %arg11: memref<1x16x32xf32, #tpu.memory_space<vmem>>) attributes {dimension_semantics = [#tpu.dimension_semantics<parallel>, #tpu.dimension_semantics<parallel>], iteration_bounds = array<i64: 2, 4>, scalar_prefetch = 0 : i64, scratch_operands = 0 : i64, tpu.core_type = #tpu.core_type<tc>, window_params = [{transform_indices = @transform_0, window_bounds = array<i64: 1, 16, 32>}, {transform_indices = @transform_1, window_bounds = array<i64: 1, 8, 32>}, {transform_indices = @transform_2, window_bounds = array<i64: 1, 8, 32>}, {pipeline_mode = #tpu.pipeline_mode<synchronous>, transform_indices = @transform_3, window_bounds = array<i64: 32, 64>}, {pipeline_mode = #tpu.pipeline_mode<synchronous>, transform_indices = @transform_4, window_bounds = array<i64: 1, 64>}, {pipeline_mode = #tpu.pipeline_mode<synchronous>, transform_indices = @transform_5, window_bounds = array<i64: 3, 64>}, {pipeline_mode = #tpu.pipeline_mode<synchronous>, transform_indices = @transform_6, window_bounds = array<i64: 1, 64>}, {pipeline_mode = #tpu.pipeline_mode<synchronous>, transform_indices = @transform_7, window_bounds = array<i64: 64, 32>}, {pipeline_mode = #tpu.pipeline_mode<synchronous>, transform_indices = @transform_8, window_bounds = array<i64: 1, 32>}, {transform_indices = @transform_9, window_bounds = array<i64: 1, 16, 32>}]} {
    %c0 = arith.constant 0 : index
    %c0_0 = arith.constant 0 : index
    %0 = vector.load %arg5[%c0, %c0_0] : memref<32x64xbf16, #tpu.memory_space<vmem>>, vector<32x64xbf16>
    %c0_1 = arith.constant 0 : index
    %c0_2 = arith.constant 0 : index
    %1 = vector.load %arg6[%c0_1, %c0_2] : memref<1x64xf32, #tpu.memory_space<vmem>>, vector<1x64xf32>
    %c0_3 = arith.constant 0 : index
    %c0_4 = arith.constant 0 : index
    %c0_5 = arith.constant 0 : index
    %2 = vector.load %arg2[%c0_3, %c0_4, %c0_5] : memref<1x16x32xbf16, #tpu.memory_space<vmem>>, vector<1x16x32xbf16>
    %3 = vector.shape_cast %2 : vector<1x16x32xbf16> to vector<16x32xbf16>
    %cst = arith.constant dense<0.000000e+00> : vector<16x64xf32>
    %4 = tpu.matmul %3, %0, %cst {dimension_numbers = #tpu.dot_dimension_numbers<[1], [0], [0], [1], [0, 0, 1, 1], [], []>} : vector<16x32xbf16>, vector<32x64xbf16>, vector<16x64xf32> -> vector<16x64xf32>
    %5 = vector.broadcast %1 : vector<1x64xf32> to vector<16x64xf32>
    %6 = arith.addf %4, %5 : vector<16x64xf32>
    %cst_6 = arith.constant 5.000000e-01 : f32
    %7 = vector.broadcast %cst_6 : f32 to vector<16x64xf32>
    %8 = arith.mulf %7, %6 : vector<16x64xf32>
    %cst_7 = arith.constant 8.510000e-01 : f32
    %9 = vector.broadcast %cst_7 : f32 to vector<16x64xf32>
    %10 = arith.mulf %9, %6 : vector<16x64xf32>
    %11 = math.tanh %10 : vector<16x64xf32>
    %12 = arith.mulf %8, %11 : vector<16x64xf32>
    %13 = arith.addf %8, %12 : vector<16x64xf32>
    %c0_8 = arith.constant 0 : index
    %c0_9 = arith.constant 0 : index
    %c0_10 = arith.constant 0 : index
    %14 = vector.load %arg3[%c0_8, %c0_9, %c0_10] : memref<1x8x32xbf16, #tpu.memory_space<vmem>>, vector<1x8x32xbf16>
    %15 = vector.shape_cast %14 : vector<1x8x32xbf16> to vector<8x32xbf16>
    %cst_11 = arith.constant dense<0.000000e+00> : vector<8x64xf32>
    %16 = tpu.matmul %15, %0, %cst_11 {dimension_numbers = #tpu.dot_dimension_numbers<[1], [0], [0], [1], [0, 0, 1, 1], [], []>} : vector<8x32xbf16>, vector<32x64xbf16>, vector<8x64xf32> -> vector<8x64xf32>
    %17 = vector.broadcast %1 : vector<1x64xf32> to vector<8x64xf32>
    %18 = arith.addf %16, %17 : vector<8x64xf32>
    %c0_12 = arith.constant 0 : index
    %c0_13 = arith.constant 0 : index
    %c0_14 = arith.constant 0 : index
    %19 = vector.load %arg4[%c0_12, %c0_13, %c0_14] : memref<1x8x32xbf16, #tpu.memory_space<vmem>>, vector<1x8x32xbf16>
    %20 = vector.shape_cast %19 : vector<1x8x32xbf16> to vector<8x32xbf16>
    %cst_15 = arith.constant dense<0.000000e+00> : vector<8x64xf32>
    %21 = tpu.matmul %20, %0, %cst_15 {dimension_numbers = #tpu.dot_dimension_numbers<[1], [0], [0], [1], [0, 0, 1, 1], [], []>} : vector<8x32xbf16>, vector<32x64xbf16>, vector<8x64xf32> -> vector<8x64xf32>
    %22 = vector.broadcast %1 : vector<1x64xf32> to vector<8x64xf32>
    %23 = arith.addf %21, %22 : vector<8x64xf32>
    %24 = vector.extract_strided_slice %18 {offsets = [7, 0], sizes = [1, 64], strides = [1, 1]} : vector<8x64xf32> to vector<1x64xf32>
    %cst_16 = arith.constant 5.000000e-01 : f32
    %25 = vector.broadcast %cst_16 : f32 to vector<1x64xf32>
    %26 = arith.mulf %25, %24 : vector<1x64xf32>
    %cst_17 = arith.constant 8.510000e-01 : f32
    %27 = vector.broadcast %cst_17 : f32 to vector<1x64xf32>
    %28 = arith.mulf %27, %24 : vector<1x64xf32>
    %29 = math.tanh %28 : vector<1x64xf32>
    %30 = arith.mulf %26, %29 : vector<1x64xf32>
    %31 = arith.addf %26, %30 : vector<1x64xf32>
    %32 = vector.extract_strided_slice %23 {offsets = [0, 0], sizes = [1, 64], strides = [1, 1]} : vector<8x64xf32> to vector<1x64xf32>
    %cst_18 = arith.constant 5.000000e-01 : f32
    %33 = vector.broadcast %cst_18 : f32 to vector<1x64xf32>
    %34 = arith.mulf %33, %32 : vector<1x64xf32>
    %cst_19 = arith.constant 8.510000e-01 : f32
    %35 = vector.broadcast %cst_19 : f32 to vector<1x64xf32>
    %36 = arith.mulf %35, %32 : vector<1x64xf32>
    %37 = math.tanh %36 : vector<1x64xf32>
    %38 = arith.mulf %34, %37 : vector<1x64xf32>
    %39 = arith.addf %34, %38 : vector<1x64xf32>
    %cst_20 = arith.constant 0.000000e+00 : f32
    %40 = vector.broadcast %cst_20 : f32 to vector<1x64xf32>
    %c0_i32 = arith.constant 0 : i32
    %41 = arith.cmpi eq, %arg1, %c0_i32 : i32
    %42 = arith.select %41, %40, %31 : vector<1x64xf32>
    %c3_i32 = arith.constant 3 : i32
    %43 = arith.cmpi eq, %arg1, %c3_i32 : i32
    %44 = arith.select %43, %40, %39 : vector<1x64xf32>
    %45 = tpu.iota {dimensions = array<i32: 0>} : vector<16x1xi32>
    %c0_i32_21 = arith.constant 0 : i32
    %46 = vector.broadcast %c0_i32_21 : i32 to vector<16x1xi32>
    %47 = arith.cmpi eq, %45, %46 : vector<16x1xi32>
    %c1_i32 = arith.constant 1 : i32
    %48 = tpu.dynamic_rotate %13 by %c1_i32 dim 0 : vector<16x64xf32>, i32 -> vector<16x64xf32>
    %49 = vector.shape_cast %47 : vector<16x1xi1> to vector<16x1xi1>
    %50 = vector.broadcast %49 : vector<16x1xi1> to vector<16x64xi1>
    %51 = vector.shape_cast %42 : vector<1x64xf32> to vector<1x64xf32>
    %52 = vector.broadcast %51 : vector<1x64xf32> to vector<16x64xf32>
    %53 = arith.select %50, %52, %48 : vector<16x64xi1>, vector<16x64xf32>
    %c15_i32 = arith.constant 15 : i32
    %54 = vector.broadcast %c15_i32 : i32 to vector<16x1xi32>
    %55 = arith.cmpi eq, %45, %54 : vector<16x1xi32>
    %c15_i32_22 = arith.constant 15 : i32
    %56 = tpu.dynamic_rotate %13 by %c15_i32_22 dim 0 : vector<16x64xf32>, i32 -> vector<16x64xf32>
    %57 = vector.shape_cast %55 : vector<16x1xi1> to vector<16x1xi1>
    %58 = vector.broadcast %57 : vector<16x1xi1> to vector<16x64xi1>
    %59 = vector.shape_cast %44 : vector<1x64xf32> to vector<1x64xf32>
    %60 = vector.broadcast %59 : vector<1x64xf32> to vector<16x64xf32>
    %61 = arith.select %58, %60, %56 : vector<16x64xi1>, vector<16x64xf32>
    %c0_23 = arith.constant 0 : index
    %c0_24 = arith.constant 0 : index
    %62 = vector.load %arg7[%c0_23, %c0_24] : memref<3x64xf32, #tpu.memory_space<vmem>>, vector<3x64xf32>
    %63 = vector.extract_strided_slice %62 {offsets = [0, 0], sizes = [1, 64], strides = [1, 1]} : vector<3x64xf32> to vector<1x64xf32>
    %64 = vector.broadcast %63 : vector<1x64xf32> to vector<16x64xf32>
    %65 = arith.mulf %53, %64 : vector<16x64xf32>
    %66 = vector.extract_strided_slice %62 {offsets = [1, 0], sizes = [1, 64], strides = [1, 1]} : vector<3x64xf32> to vector<1x64xf32>
    %67 = vector.broadcast %66 : vector<1x64xf32> to vector<16x64xf32>
    %68 = arith.mulf %13, %67 : vector<16x64xf32>
    %69 = arith.addf %65, %68 : vector<16x64xf32>
    %70 = vector.extract_strided_slice %62 {offsets = [2, 0], sizes = [1, 64], strides = [1, 1]} : vector<3x64xf32> to vector<1x64xf32>
    %71 = vector.broadcast %70 : vector<1x64xf32> to vector<16x64xf32>
    %72 = arith.mulf %61, %71 : vector<16x64xf32>
    %73 = arith.addf %69, %72 : vector<16x64xf32>
    %c0_25 = arith.constant 0 : index
    %c0_26 = arith.constant 0 : index
    %74 = vector.load %arg8[%c0_25, %c0_26] : memref<1x64xf32, #tpu.memory_space<vmem>>, vector<1x64xf32>
    %75 = vector.broadcast %74 : vector<1x64xf32> to vector<16x64xf32>
    %76 = arith.addf %73, %75 : vector<16x64xf32>
    %77 = arith.truncf %76 : vector<16x64xf32> to vector<16x64xbf16>
    %cst_27 = arith.constant 5.000000e-01 : bf16
    %78 = vector.broadcast %cst_27 : bf16 to vector<16x64xbf16>
    %79 = arith.mulf %78, %77 : vector<16x64xbf16>
    %cst_28 = arith.constant 8.515620e-01 : bf16
    %80 = vector.broadcast %cst_28 : bf16 to vector<16x64xbf16>
    %81 = arith.mulf %80, %77 : vector<16x64xbf16>
    %82 = math.tanh %81 : vector<16x64xbf16>
    %83 = arith.mulf %79, %82 : vector<16x64xbf16>
    %84 = arith.addf %79, %83 : vector<16x64xbf16>
    %c0_29 = arith.constant 0 : index
    %c0_30 = arith.constant 0 : index
    %85 = vector.load %arg9[%c0_29, %c0_30] : memref<64x32xbf16, #tpu.memory_space<vmem>>, vector<64x32xbf16>
    %cst_31 = arith.constant dense<0.000000e+00> : vector<16x32xf32>
    %86 = tpu.matmul %84, %85, %cst_31 {dimension_numbers = #tpu.dot_dimension_numbers<[1], [0], [0], [1], [0, 0, 1, 1], [], []>} : vector<16x64xbf16>, vector<64x32xbf16>, vector<16x32xf32> -> vector<16x32xf32>
    %c0_32 = arith.constant 0 : index
    %c0_33 = arith.constant 0 : index
    %87 = vector.load %arg10[%c0_32, %c0_33] : memref<1x32xf32, #tpu.memory_space<vmem>>, vector<1x32xf32>
    %88 = vector.broadcast %87 : vector<1x32xf32> to vector<16x32xf32>
    %89 = arith.addf %86, %88 : vector<16x32xf32>
    %c0_34 = arith.constant 0 : index
    %c0_35 = arith.constant 0 : index
    %c0_36 = arith.constant 0 : index
    %90 = vector.load %arg11[%c0_34, %c0_35, %c0_36] : memref<1x16x32xf32, #tpu.memory_space<vmem>>, vector<1x16x32xf32>
    %91 = vector.shape_cast %90 : vector<1x16x32xf32> to vector<16x32xf32>
    %92 = vector.shape_cast %89 : vector<16x32xf32> to vector<1x16x32xf32>
    tpu.vector_store %arg11[%c0_34, %c0_35, %c0_36], %92 {strides = array<i32>} : memref<1x16x32xf32, #tpu.memory_space<vmem>>, vector<1x16x32xf32>,
    return
  }
  func.func @transform_0(%arg0: i32, %arg1: i32) -> (i32, i32, i32) {
    %c0_i32 = arith.constant 0 : i32
    %c0_i32_0 = arith.constant 0 : i32
    return %arg0, %arg1, %c0_i32 : i32, i32, i32
  }
  func.func @transform_1(%arg0: i32, %arg1: i32) -> (i32, i32, i32) {
    %c2_i32 = arith.constant 2 : i32
    %0 = arith.muli %arg1, %c2_i32 : i32
    %c1_i32 = arith.constant 1 : i32
    %1 = arith.subi %0, %c1_i32 : i32
    %c0_i32 = arith.constant 0 : i32
    %2 = arith.maxsi %1, %c0_i32 : i32
    %c0_i32_0 = arith.constant 0 : i32
    %c0_i32_1 = arith.constant 0 : i32
    return %arg0, %2, %c0_i32_0 : i32, i32, i32
  }
  func.func @transform_2(%arg0: i32, %arg1: i32) -> (i32, i32, i32) {
    %c1_i32 = arith.constant 1 : i32
    %0 = arith.addi %arg1, %c1_i32 : i32
    %c2_i32 = arith.constant 2 : i32
    %1 = arith.muli %0, %c2_i32 : i32
    %c7_i32 = arith.constant 7 : i32
    %2 = arith.minsi %1, %c7_i32 : i32
    %c0_i32 = arith.constant 0 : i32
    %c0_i32_0 = arith.constant 0 : i32
    return %arg0, %2, %c0_i32 : i32, i32, i32
  }
  func.func @transform_3(%arg0: i32, %arg1: i32) -> (i32, i32) {
    %c0_i32 = arith.constant 0 : i32
    %c0_i32_0 = arith.constant 0 : i32
    %c0_i32_1 = arith.constant 0 : i32
    return %c0_i32, %c0_i32_0 : i32, i32
  }
  func.func @transform_4(%arg0: i32, %arg1: i32) -> (i32, i32) {
    %c0_i32 = arith.constant 0 : i32
    %c0_i32_0 = arith.constant 0 : i32
    %c0_i32_1 = arith.constant 0 : i32
    return %c0_i32, %c0_i32_0 : i32, i32
  }
  func.func @transform_5(%arg0: i32, %arg1: i32) -> (i32, i32) {
    %c0_i32 = arith.constant 0 : i32
    %c0_i32_0 = arith.constant 0 : i32
    %c0_i32_1 = arith.constant 0 : i32
    return %c0_i32, %c0_i32_0 : i32, i32
  }
  func.func @transform_6(%arg0: i32, %arg1: i32) -> (i32, i32) {
    %c0_i32 = arith.constant 0 : i32
    %c0_i32_0 = arith.constant 0 : i32
    %c0_i32_1 = arith.constant 0 : i32
    return %c0_i32, %c0_i32_0 : i32, i32
  }
  func.func @transform_7(%arg0: i32, %arg1: i32) -> (i32, i32) {
    %c0_i32 = arith.constant 0 : i32
    %c0_i32_0 = arith.constant 0 : i32
    %c0_i32_1 = arith.constant 0 : i32
    return %c0_i32, %c0_i32_0 : i32, i32
  }
  func.func @transform_8(%arg0: i32, %arg1: i32) -> (i32, i32) {
    %c0_i32 = arith.constant 0 : i32
    %c0_i32_0 = arith.constant 0 : i32
    %c0_i32_1 = arith.constant 0 : i32
    return %c0_i32, %c0_i32_0 : i32, i32
  }
  func.func @transform_9(%arg0: i32, %arg1: i32) -> (i32, i32, i32) {
    %c0_i32 = arith.constant 0 : i32
    %c0_i32_0 = arith.constant 0 : i32
    return %arg0, %arg1, %c0_i32 : i32, i32, i32
  }
}

</mosaic_0001>

<bundles_post_ra>
// kernel: tpu_custom_call.1
= control target key start
LH: loop header
LB: loop body
LE: loop exit
PB: predicated region body
PF: predicated region fallthrough
CT: control target
= control target key end

     0   :  { %s1230_s30 = smov 0   ;;  %s1232_s10 = smov 0   ;;  %s1345_s0 = inlined_call_operand.vmem [shape: bf16[2,64,32], index: 0, kind: input, shape index: {}]   ;;  %s1346_s1 = inlined_call_operand.vmem [shape: bf16[2,64,32], index: 1, kind: input, shape index: {}]   ;;  %s1347_s2 = inlined_call_operand.vmem [shape: bf16[2,64,32], index: 2, kind: input, shape index: {}]   ;;  %s1348_s3 = inlined_call_operand.vmem [shape: bf16[32,64], index: 3, kind: input, shape index: {}]   ;;  %s1349_s4 = inlined_call_operand.vmem [shape: f32[1,64], index: 4, kind: input, shape index: {}]   ;;  %s1350_s5 = inlined_call_operand.vmem [shape: f32[3,64], index: 5, kind: input, shape index: {}]   ;;  %s1351_s6 = inlined_call_operand.vmem [shape: f32[1,64], index: 6, kind: input, shape index: {}]   ;;  %s1352_s7 = inlined_call_operand.vmem [shape: bf16[64,32], index: 7, kind: input, shape index: {}]   ;;  %s1353_s8 = inlined_call_operand.vmem [shape: f32[1,32], index: 8, kind: input, shape index: {}]   ;;  %s1354_s9 = inlined_call_operand.vmem [shape: f32[2,64,32], index: 9, kind: output, shape index: {}]  }
   0x1   :  { %s1234_s11 = smov 0   ;;  %s1236_s12 = smov 0  }
   0x2   :  { %s1238_s13 = smov 0  }
   0x3 LB: > { %s28_s14 = sadd.s32 1, %s1168_s11  ;;  %s31_s15 = sadd.s32 1, %s1172_s12  ;;  %s1176_s13 = sphi %s1238_s13, %s19_s13   ;;  %s1172_s12 = sphi %s1236_s12, %s1360_s12   ;;  %s1168_s11 = sphi %s1234_s11, %s1359_s11   ;;  %s1164_s10 = sphi %s1232_s10, %s1358_s10   ;;  %s1160_s30 = sphi %s1230_s30, %s1357_s30  }
   0x4   : > { %p29_p0 = scmp.ge.s32.totalorder %s28_s14, 4  ;;  %p983_p1 = scmp.ge.s32.totalorder %s1176_s13, 1 }
   0x5   : > { %p370_p2 = scmp.lt.s32.totalorder %s1176_s13, 9 }
   0x6   : > { %s1362_s14 = smov (%p29_p0, %s28_s14), 0  ;;  %s1364_s15 = smov (!%p29_p0, %s31_s15), %s1172_s12 }
   0x7   : > { %p371_p3 = pnand %p983_p1, %p370_p2  ;;  %p33_p4 = scmp.ge.s32.totalorder %s1364_s15, 2 }
   0x8   : > { %v1121_v0 = vld [vmem:[%s1348_s3] sm:$0xff] (!%p371_p3)   ;;  %v1178_v1 = vmov (!%p371_p3), 0.0   ;;  %v1122_v2 = vld [vmem:[%s1348_s3 + $0x8] sm:$0xff] (!%p371_p3)   ;;  %s984_s20 = sshll.u32 (!%p371_p3), %s1160_s30, 1  ;;  %p439_p5 = scmp.lt.s32.totalorder (!%p371_p3), %s1164_s10, 1  ;;  %vm1179_vm0 = vmmov (!%p371_p3), 0   ;;  %v686_v22 = vlaneseq (!%p371_p3) }
   0x9   : > { %s1366_s15 = smov (%p33_p4, %s1364_s15), 0  ;;  %374 = sbr.rel (%p371_p3) target bundleno = 510 (0x1fe), region = 56 }
   0xa   : > { %1043 = vmatprep.subr.bf16.mxu0 (!%p371_p3), %v1178_v1  ;;  %1051 = vmatprep.subr.bf16.mxu1 (!%p371_p3), %v1178_v1  ;;  %p441_p6 = scmp.lt.s32.totalorder (!%p371_p3), %s984_s20, 7  ;;  %s988_s21 = sadd.s32 (!%p371_p3), 4294967295, %s984_s20  ;;  %vm523_vm1 = vcmask (!%p371_p3), 261120   ;;  %v1124_v6 = vld [vmem:[%s1352_s7] sm:$0xff] (!%p371_p3)   ;;  %v1125_v7 = vld [vmem:[%s1352_s7 + $0x8] sm:$0xff] (!%p371_p3)   ;;  %v1126_v8 = vld [vmem:[%s1352_s7 + $0x10] sm:$0xff] (!%p371_p3)  }
   0xb   : > { %1044 = vmatpush3.bf16.msra.mxu0 (!%p371_p3), %v1121_v0  ;;  %1052 = vmatpush3.bf16.msra.mxu1 (!%p371_p3), %v1121_v0  ;;  %p450_p7 = scmp.gt.s32.totalorder (!%p371_p3), %s988_s21, 0  ;;  %p989_p8 = scmp.lt.s32.totalorder (!%p371_p3), %s988_s21, 7  ;;  %v1127_v9 = vld [vmem:[%s1352_s7 + $0x18] sm:$0xff] (!%p371_p3)   ;;  %v1005_v10 = vld [vmem:[%s1349_s4] ss:$0 sm:$0xff] (!%p371_p3)  ;;  %v687_v32 = vshrl.u32 (!%p371_p3), %v686_v22, 7 }
   0xc   : > { %1045 = vmatprep.subr.bf16.mxu0 (!%p371_p3), %v1178_v1  ;;  %1053 = vmatprep.subr.bf16.mxu1 (!%p371_p3), %v1178_v1  ;;  %s1028_s26 = sadd.s32 (!%p371_p3), 2, %s984_s20  ;;  %p676_p10 = scmp.eq.s32.totalorder (!%p371_p3), %s1160_s30, 0  ;;  %v723_v39 = vld [vmem:[%s1350_s5] sm:$0x7] (!%p371_p3)  ;;  %vm800_vm8 = vcmask (!%p371_p3), 523264  }
   0xd   : > { %1047 = vmatprep.mubr.msk.bf16.mxu0 (!%p371_p3), %vm1179_vm0, %v1178_v1  ;;  %1055 = vmatprep.mubr.msk.bf16.mxu1 (!%p371_p3), %vm1179_vm0, %v1178_v1  ;;  %p466_p9 = scmp.lt.s32.totalorder (!%p371_p3), %s1028_s26, 7  ;;  %p681_p11 = scmp.eq.s32.totalorder (!%p371_p3), %s1160_s30, 3  ;;  %v732_v36 = vsub.s32 (!%p371_p3), 1, %v687_v32  ;;  %v719_v41 = vsub.s32 (!%p371_p3), 0, %v687_v32  ;;  %v740_v44 = vsub.s32 (!%p371_p3), 2, %v687_v32  ;;  %vm693_vm3 = vcmp.lt.s32.totalorder (!%p371_p3), %v687_v32, 1 }
   0xe   : > { %vm710_vm4 = vcmp.lt.s32.totalorder (!%p371_p3), %v687_v32, 7  ;;  %v702_v57 = vsub.s32 (!%p371_p3), 7, %v687_v32  ;;  %v688_v60 = vadd.s32 (!%p371_p3), 8, %v687_v32  ;;  %vm689_vm6 = vcmp.eq.s32.totalorder (!%p371_p3), %v687_v32, 0 }
   0xf   : > { %1046 = vmatpush3.bf16.msra.mxu0 (!%p371_p3), %v1122_v2  ;;  %1054 = vmatpush3.bf16.msra.mxu1 (!%p371_p3), %v1122_v2  ;;  %v733_v45 = vrot.slane (!%p371_p3), %v723_v39, %v732_v36  ;;  %v727_v51 = vrot.slane (!%p371_p3), %v723_v39, %v719_v41 }
  0x10   : > { %s1368_s10 = smov (!%p439_p5, %s1164_s10), 1  ;;  %1059 = vmatprep.subr.bf16.mxu0 %v1178_v1  ;;  %1067 = vmatprep.subr.bf16.mxu1 %v1178_v1  ;;  %s1370_s21 = smov (!%p450_p7, %s988_s21), 0  ;;  %vm707_vm7 = vcmp.eq.s32.totalorder %v688_v60, 15 }
  0x11   : > { %s442_s22 = scalar_select %p441_p6, %s984_s20, 7 }
  0x12   : > { %s985_s23 = sshll.u32 %s1368_s10, 3  ;;  %s1372_s26 = smov (!%p466_p9, %s1028_s26), 7 }
  0x13   : > { %s1275_s24 = sadd.s32 %s985_s23, %s442_s22  ;;  %s1374_s21 = smov (!%p989_p8, %s1370_s21), 7 }
  0x14   : > { %s986_s25 = sshll.u32 %s1275_s24, 2  ;;  %s1376_s26 = smov (!%p466_p9, %s1372_s26), 7 }
  0x15   : > { %s446_s29 = scalar_lea.vmem %s1345_s0, %s986_s25  ;;  %s457_s10 = sadd.s32 %s1374_s21, %s985_s23 }
  0x16   : > { %v1123_v3 = vld [vmem:[%s446_s29] sm:$0xff]   ;;  %s995_s16 = sshll.u32 %s457_s10, 2  ;;  %s473_s17 = sadd.s32 %s985_s23, %s1376_s26 }
  0x17   : > { %1048 = vmatmul.mubr.msk.bf16.vlgmr.msra.gmra.mrb[0].mxu0 %vm523_vm1, %v1123_v3  ;;  %s459_s20 = scalar_lea.vmem %s1346_s1, %s995_s16  ;;  %s1001_s22 = sshll.u32 %s473_s17, 2 }
  0x18   : > { %1060 = vmatpush3.bf16.msra.mxu0 %v1121_v0  ;;  %1063 = vmatprep.mubr.msk.bf16.mxu0 %vm1179_vm0, %v1178_v1  ;;  %v578_v4 = vld [vmem:[%s459_s20] sm:$0xf]  ;;  %s475_s28 = scalar_lea.vmem %s1347_s2, %s1001_s22  ;;  %s1004_s23 = sshll.u32 %s1275_s24, 3 }
  0x19   : > { %1061 = vmatprep.subr.bf16.mxu0 %v1178_v1  ;;  %1056 = vmatmul.mubr.msk.bf16.vlgmr.msra.gmra.mrb[0].mxu1 %vm523_vm1, %v578_v4  ;;  %v622_v5 = vld [vmem:[%s475_s28] sm:$0xf]  ;;  %s677_s22 = scalar_select %p676_p10, 1, 0 }
  0x1a   : > { %1075 = vmatprep.mubr.msk.bf16.mxu1 %vm1179_vm0, %v1178_v1  ;;  %1068 = vmatpush3.bf16.msra.mxu1 %v1124_v6  ;;  %s682_s28 = scalar_select %p681_p11, 1, 0 }
  0x1b   : > { %1069 = vmatprep.subr.bf16.mxu1 %v1178_v1  ;;  %v678_v40 = vstv %s677_s22  ;;  %s488_s17 = scalar_lea.vmem %s1354_s9, %s1004_s23 }
  0x1c   : > { %1062 = vmatpush3.bf16.msra.mxu0 %v1122_v2  ;;  %vm1312_vm2 = vcmp.eq.s32.totalorder %v678_v40, 1  ;;  %v683_v59 = vstv %s682_s28 }
  0x1d   : > { %vm684_vm5 = vcmp.eq.s32.totalorder %v683_v59, 1 }
  0x1e   : > { %1070 = vmatpush3.bf16.msra.mxu1 %v1125_v7 }
  0x1f   : > { %1064 = vmatmul.mubr.msk.bf16.vlgmr.msra.gmra.mrb[4].mxu0 %vm523_vm1, %v622_v5  ;;  %1071 = vmatprep.subr.bf16.mxu1 %v1178_v1 }
  0x22   : > { %1072 = vmatpush3.bf16.msra.mxu1 %v1126_v8 }
  0x23   : > { %1073 = vmatprep.subr.bf16.mxu1 %v1178_v1 }
  0x26   : > { %1074 = vmatpush3.bf16.msra.mxu1 %v1127_v9  ;;  %v741_v9 = vrot.slane %v723_v39, %v740_v44 }
  0xea   : > { %v561_v11 = vpop.f32.mrb[0].mxu0 }
  0xeb   : > { %v562_v12 = vadd.f32 %v1005_v10, %v561_v11  ;;  %v1049_v13 = vpop.f32.mrb[1].mxu0 }
  0xec   : > { %v564_v14 = vpop.f32.mrb[2].mxu0  ;;  %v616_v19 = vpop.f32.mrb[0].mxu1 }
  0xed   : > { %v570_v15 = vmul.f32 0.851, %v562_v12  ;;  %v565_v16 = vadd.f32 %v1005_v10, %v564_v14  ;;  %v1050_v17 = vpop.f32.mrb[3].mxu0  ;;  %v617_v20 = vadd.f32 %v1005_v10, %v616_v19  ;;  %v1057_v21 = vpop.f32.mrb[1].mxu1  ;;  %v568_v33 = vmul.f32 0.5, %v562_v12 }
  0xee   : > { %v619_v23 = vpop.f32.mrb[2].mxu1 }
  0xef   : > { %1128 = vtanh.f32 %v570_v15  ;;  %v571_v18 = vmul.f32 0.851, %v565_v16  ;;  %v667_v25 = vmul.f32 0.851, %v617_v20  ;;  %v1058_v26 = vpop.f32.mrb[3].mxu1  ;;  %v569_v37 = vmul.f32 0.5, %v565_v16 }
  0xf0   : > { %v666_v46 = vmul.f32 0.5, %v617_v20  ;;  %v1012_v20 = vld [vmem:[%s1351_s6] ss:$0 sm:$0xff] }
  0xf1   : > { %1130 = vtanh.f32 %v571_v18 }
  0xf2   : > { %v660_v24 = vpop.f32.mrb[4].mxu0  ;;  %1132 = vtanh.f32 %v667_v25 }
  0xf3   : > { %v661_v27 = vadd.f32 %v1005_v10, %v660_v24  ;;  %v1065_v28 = vpop.f32.mrb[5].mxu0 }
  0xf4   : > { %v663_v29 = vpop.f32.mrb[6].mxu0 }
  0xf5   : > { %v672_v30 = vmul.f32 0.851, %v661_v27  ;;  %v1066_v31 = vpop.f32.mrb[7].mxu0  ;;  %v671_v58 = vmul.f32 0.5, %v661_v27 }
  0xf7   : > { %1134 = vtanh.f32 %v672_v30  ;;  %v1013_v30 = vld [vmem:[%s1353_s8] ss:$0 sm:$0xff] }
  0xf9   : > { %v1129_v34 = vpop.eup %1128 }
  0xfa   : > { %v574_v35 = vmul.f32 %v1129_v34, %v568_v33 }
  0xfb   : > { %v1131_v38 = vpop.eup %1130 }
  0xfc   : > { %v576_v42 = vadd.f32 %v574_v35, %v568_v33  ;;  %v575_v43 = vmul.f32 %v1131_v38, %v569_v37  ;;  %v1133_v49 = vpop.eup %1132 }
  0xfd   : > { %v669_v53 = vmul.f32 %v1133_v49, %v666_v46 }
  0xfe   : > { %v577_v48 = vadd.f32 %v575_v43, %v569_v37  ;;  %v691_v50 = vrot.slane %v576_v42, 7  ;;  %v708_v52 = vrot.slane %v576_v42, 1  ;;  %v734_v12 = vmul.f32 %v733_v45, %v576_v42 }
  0xff   : > { %v670_v61 = vadd.f32 %v669_v53, %v666_v46 }
 0x100   : > { %v692_v54 = vrot.slane %v577_v48, 7  ;;  %v709_v55 = vrot.slane %v577_v48, 1  ;;  %v735_v2 = vmul.f32 %v733_v45, %v577_v48 }
 0x101   : > { %v1135_v56 = vpop.eup %1134  ;;  %v680_v5 = vsel %vm1312_vm2, 0.0, %v670_v61 }
 0x102   : > { %v694_v62 = vsel %vm693_vm3, %v691_v50, %v692_v54  ;;  %v695_v63 = vsel %vm693_vm3, %v692_v54, %v691_v50  ;;  %v711_v0 = vsel %vm710_vm4, %v708_v52, %v709_v55  ;;  %v712_v1 = vsel %vm710_vm4, %v709_v55, %v708_v52 }
 0x103   : > { %v674_v3 = vmul.f32 %v1135_v56, %v671_v58  ;;  %v729_v4 = vmul.f32 %v727_v51, %v694_v62  ;;  %v703_v6 = vrot.slane %v680_v5, %v702_v57  ;;  %v742_v15 = vmul.f32 %v741_v9, %v711_v0 }
 0x105   : > { %v675_v7 = vadd.f32 %v674_v3, %v671_v58  ;;  %v737_v8 = vadd.f32 %v735_v2, %v729_v4  ;;  %v704_v11 = vsel %vm689_vm6, %v703_v6, %v695_v63 }
 0x106   : > { %v728_v14 = vmul.f32 %v727_v51, %v704_v11 }
 0x107   : > { %v685_v10 = vsel %vm684_vm5, 0.0, %v675_v7 }
 0x108   : > { %v720_v13 = vrot.slane %v685_v10, %v719_v41  ;;  %v736_v17 = vadd.f32 %v734_v12, %v728_v14 }
 0x10a   : > { %v722_v16 = vsel %vm707_vm7, %v720_v13, %v712_v1  ;;  %v744_v19 = vadd.f32 %v742_v15, %v736_v17 }
 0x10b   : > { %v743_v18 = vmul.f32 %v741_v9, %v722_v16 }
 0x10c   : > { %v753_v23 = vadd.f32 %v1012_v20, %v744_v19 }
 0x10d   : > { %v745_v21 = vadd.f32 %v743_v18, %v737_v8 }
 0x10f   : > { %v754_v22 = vadd.f32 %v1012_v20, %v745_v21 }
 0x111   : > { %v755_v24 = vpack.c.bf16 %v754_v22, %v753_v23 }
 0x113   : > { %v757_v25 = vmul.bf16 1062879066, %v755_v24  ;;  %v756_v26 = vmul.bf16 1056980736, %v755_v24 }
 0x115   : > { %1136 = vtanh.bf16 %v757_v25 }
 0x120   : > { %v1137_v27 = vpop.eup %1136 }
 0x121   : > { %v759_v28 = vmul.bf16 %v1137_v27, %v756_v26 }
 0x123   : > { %v760_v29 = vadd.bf16 %v759_v28, %v756_v26 }
 0x125   : > { %1076 = vmatmul.mubr.msk.bf16.vlgmr.msra.gmra.mrb[4].mxu1 %vm800_vm8, %v760_v29 }
 0x1f8   : > { %v838_v31 = vpop.f32.mrb[4].mxu1 }
 0x1f9   : > { %v839_v32 = vadd.f32 %v1013_v30, %v838_v31  ;;  %v1077_v33 = vpop.f32.mrb[5].mxu1 }
 0x1fa   : > { %v841_v34 = vpop.f32.mrb[6].mxu1 }
 0x1fb   : > { %845 = vst.msk [vmem:[%s488_s17] sm:$0xff] %vm523_vm1, %v839_v32  ;;  %v842_v35 = vadd.f32 %v1013_v30, %v841_v34  ;;  %v1078_v36 = vpop.f32.mrb[7].mxu1 }
 0x1fd   : > { %846 = vst.msk [vmem:[%s488_s17 + $0x8] sm:$0xff] %vm523_vm1, %v842_v35 }
 0x1fe PF: > { %s19_s13 = sadd.s32 1, %s1176_s13   ;;  %s1357_s30 = smov %s1168_s11 }
 0x1ff   : > { %p16_p12 = scmp.ge.s32.totalorder %s19_s13, 10   ;;  %s1358_s10 = smov %s1172_s12 }
 0x200   : > { %s1359_s11 = smov %s1362_s14  ;;  %s1360_s12 = smov %s1366_s15 }
 0x201   :  { %18 = sbr.rel (!%p16_p12) target bundleno = 3 (0x3), region = 92 }

</bundles_post_ra>
